<compile_context>
chip_gen: v5e
topology: v5e:2x2
jax: 0.10.0
libtpu: 0.0.40
codegen_flags: <defaults>
</compile_context>

<pallas_src>
import jax
import jax.numpy as jnp
from jax.experimental import pallas as pl
from jax.experimental.pallas import tpu as pltpu

HIDDEN = 128
SUBLANE_BF16 = 16       # bf16 packs 16 rows per sublane tile
SINGLE_TILE_MAX = 256   # below this, one grid step (no benefit from splitting)
MAX_TILE = 1024         # target rows per grid step for large batches


def _round_up(n, m):
    return ((n + m - 1) // m) * m


# --------------------------------------------------------------------------- #
# Kernel: one batch tile through all three layers.
# --------------------------------------------------------------------------- #
def qnet_kernel(x_ref, w1_ref, b1_ref, w2_ref, b2_ref, w3_ref, b3_ref, out_ref):
    # fc1 + relu  (bf16 x bf16 -> f32 accumulate on the MXU, f32 epilogue on VPU)
    h1 = jnp.dot(x_ref[...], w1_ref[...], preferred_element_type=jnp.float32)
    h1 = jnp.maximum(h1 + b1_ref[...], 0.0)
    # fc2 + relu
    h2 = jnp.dot(h1.astype(w2_ref.dtype), w2_ref[...],
                 preferred_element_type=jnp.float32)
    h2 = jnp.maximum(h2 + b2_ref[...], 0.0)
    # fc3 (no activation) -> (block_batch, output_dim) f32 store (unpadded)
    out = jnp.dot(h2.astype(w3_ref.dtype), w3_ref[...],
                  preferred_element_type=jnp.float32) + b3_ref[...]
    out_ref[...] = out.astype(out_ref.dtype)


# --------------------------------------------------------------------------- #
# One-time parameter preparation (hoisted out of the per-call path).
# --------------------------------------------------------------------------- #
def prepare_params(params, compute_dtype=jnp.bfloat16):
    """Cast weights to the MXU compute dtype and biases to f32 once.

    Call once and cache the result next to the params; qnetwork_forward then
    does no per-call weight casting / padding.
    """
    return {
        "w1": jnp.asarray(params["w1"], compute_dtype),
        "b1": jnp.asarray(params["b1"], jnp.float32).reshape(1, -1),
        "w2": jnp.asarray(params["w2"], compute_dtype),
        "b2": jnp.asarray(params["b2"], jnp.float32).reshape(1, -1),
        "w3": jnp.asarray(params["w3"], compute_dtype),
        "b3": jnp.asarray(params["b3"], jnp.float32).reshape(1, -1),
    }


# --------------------------------------------------------------------------- #
# Batch tiling: pick the tile COUNT first, then even tile size (16-aligned).
# --------------------------------------------------------------------------- #
def _batch_tiling(B, block_batch=None):
    B_pad = _round_up(B, SUBLANE_BF16)
    if block_batch is None:
        if B_pad <= SINGLE_TILE_MAX:
            block_batch = B_pad                       # single grid step
        else:
            # >= 2 tiles (both v7x TCs), ~MAX_TILE rows per tile, evened out.
            num_tiles = max(2, pl.cdiv(B_pad, MAX_TILE))
            block_batch = _round_up(pl.cdiv(B_pad, num_tiles), SUBLANE_BF16)
    else:
        block_batch = min(_round_up(block_batch, SUBLANE_BF16), B_pad)
    grid_b = pl.cdiv(B_pad, block_batch)
    return block_batch, grid_b, grid_b * block_batch


# --------------------------------------------------------------------------- #
# Forward wrapper.
# --------------------------------------------------------------------------- #
def qnetwork_forward(x, prepared, *, block_batch=None):
    """x: (B, input_dim) float32.  prepared: output of prepare_params()."""
    B, input_dim = x.shape
    compute_dtype = prepared["w1"].dtype
    output_dim = prepared["w3"].shape[1]

    block_batch, grid_b, B_final = _batch_tiling(B, block_batch)

    # Only pad the batch dim when needed; otherwise a plain cast.
    if B_final == B:
        x_p = x.astype(compute_dtype)
    else:
        x_p = jnp.zeros((B_final, input_dim), compute_dtype).at[:B].set(
            x.astype(compute_dtype))

    in_specs = [
        pl.BlockSpec((block_batch, input_dim), lambda i: (i, 0)),   # x (streamed)
        pl.BlockSpec((input_dim, HIDDEN), lambda i: (0, 0)),        # w1 (resident)
        pl.BlockSpec((1, HIDDEN), lambda i: (0, 0)),                # b1 (resident)
        pl.BlockSpec((HIDDEN, HIDDEN), lambda i: (0, 0)),           # w2 (resident)
        pl.BlockSpec((1, HIDDEN), lambda i: (0, 0)),                # b2 (resident)
        pl.BlockSpec((HIDDEN, output_dim), lambda i: (0, 0)),       # w3 (resident)
        pl.BlockSpec((1, output_dim), lambda i: (0, 0)),            # b3 (resident)
    ]
    out_specs = pl.BlockSpec((block_batch, output_dim), lambda i: (i, 0))

    out = pl.pallas_call(
        qnet_kernel,
        grid=(grid_b,),
        in_specs=in_specs,
        out_specs=out_specs,
        out_shape=jax.ShapeDtypeStruct((B_final, output_dim), jnp.float32),
        compiler_params=pltpu.CompilerParams(
            dimension_semantics=("parallel",),
        ),
    )(x_p, prepared["w1"], prepared["b1"], prepared["w2"], prepared["b2"],
      prepared["w3"], prepared["b3"])

    # Drop padded batch rows only when we actually padded.
    if B_final != B:
        out = out[:B]
    return out


# --------------------------------------------------------------------------- #
# Reference math / init (for the self-test).
# --------------------------------------------------------------------------- #
def init_params(key, input_dim, output_dim):
    """Deterministic synthetic init (shapes match nn.Linear layers, transposed)."""
    k1, k2, k3, k4, k5, k6 = jax.random.split(key, 6)
    scale = 0.1
    return {
        # stored as (in, out) == PyTorch weight.T
        "w1": scale * jax.random.normal(k1, (input_dim, HIDDEN), jnp.float32),
        "b1": scale * jax.random.normal(k2, (1, HIDDEN), jnp.float32),
        "w2": scale * jax.random.normal(k3, (HIDDEN, HIDDEN), jnp.float32),
        "b2": scale * jax.random.normal(k4, (1, HIDDEN), jnp.float32),
        "w3": scale * jax.random.normal(k5, (HIDDEN, output_dim), jnp.float32),
        "b3": scale * jax.random.normal(k6, (1, output_dim), jnp.float32),
    }


def reference_forward(x, p, compute_dtype=jnp.bfloat16):
    """Same math as the kernel (bf16 matmul operands, f32 accumulation/epilogue)."""
    q = lambda a: a.astype(compute_dtype).astype(jnp.float32)
    h1 = jnp.maximum(q(x) @ q(p["w1"]) + p["b1"], 0.0)
    h2 = jnp.maximum(q(h1) @ q(p["w2"]) + p["b2"], 0.0)
    return q(h2) @ q(p["w3"]) + p["b3"]


def reference_forward_f32(x, p):
    h1 = jnp.maximum(x @ p["w1"] + p["b1"], 0.0)
    h2 = jnp.maximum(h1 @ p["w2"] + p["b2"], 0.0)
    return h2 @ p["w3"] + p["b3"]


if __name__ == "__main__":
    key = jax.random.PRNGKey(0)
    kx, kx2, kp = jax.random.split(key, 3)

    input_dim = 4      # e.g. CartPole observation dim
    output_dim = 2     # e.g. CartPole action dim

    params = init_params(kp, input_dim, output_dim)
    prepared = prepare_params(params)              # one-time, cached

    fwd = jax.jit(qnetwork_forward)                # hot path: pad/cast fused w/ call

    # --- small RL-style batch (single tile) ---------------------------------
    batch = 8
    x = jax.random.normal(kx, (batch, input_dim), jnp.float32)
    out = jax.block_until_ready(fwd(x, prepared))
    assert out.shape == (batch, output_dim)
    assert jnp.allclose(out, reference_forward(x, params), atol=1e-3, rtol=1e-3)
    assert jnp.allclose(out, reference_forward_f32(x, params), atol=5e-2, rtol=5e-2)

    # --- medium batch (exercises the 2-tile "parallel" path + masked store) -
    batch2 = 272
    x2 = jax.random.normal(kx2, (batch2, input_dim), jnp.float32)
    out2 = jax.block_until_ready(fwd(x2, prepared))
    assert out2.shape == (batch2, output_dim)
    assert jnp.allclose(out2, reference_forward(x2, params), atol=1e-3, rtol=1e-3)
    assert jnp.allclose(out2, reference_forward_f32(x2, params), atol=5e-2, rtol=5e-2)

    print("KERNEL_OK")
</pallas_src>

<mosaic_0001>
module attributes {stable_mosaic.version = 11 : i64} {
  func.func @qnet_kernel(%arg0: i32, %arg1: memref<16x4xbf16, #tpu.memory_space<vmem>>, %arg2: memref<4x128xbf16, #tpu.memory_space<vmem>>, %arg3: memref<1x128xf32, #tpu.memory_space<vmem>>, %arg4: memref<128x128xbf16, #tpu.memory_space<vmem>>, %arg5: memref<1x128xf32, #tpu.memory_space<vmem>>, %arg6: memref<128x2xbf16, #tpu.memory_space<vmem>>, %arg7: memref<1x2xf32, #tpu.memory_space<vmem>>, %arg8: memref<16x2xf32, #tpu.memory_space<vmem>>) attributes {dimension_semantics = [#tpu.dimension_semantics<parallel>], iteration_bounds = array<i64: 1>, scalar_prefetch = 0 : i64, scratch_operands = 0 : i64, tpu.core_type = #tpu.core_type<tc>, window_params = [{transform_indices = @transform_0, window_bounds = array<i64: 16, 4>}, {pipeline_mode = #tpu.pipeline_mode<synchronous>, transform_indices = @transform_1, window_bounds = array<i64: 4, 128>}, {pipeline_mode = #tpu.pipeline_mode<synchronous>, transform_indices = @transform_2, window_bounds = array<i64: 1, 128>}, {pipeline_mode = #tpu.pipeline_mode<synchronous>, transform_indices = @transform_3, window_bounds = array<i64: 128, 128>}, {pipeline_mode = #tpu.pipeline_mode<synchronous>, transform_indices = @transform_4, window_bounds = array<i64: 1, 128>}, {pipeline_mode = #tpu.pipeline_mode<synchronous>, transform_indices = @transform_5, window_bounds = array<i64: 128, 2>}, {pipeline_mode = #tpu.pipeline_mode<synchronous>, transform_indices = @transform_6, window_bounds = array<i64: 1, 2>}, {transform_indices = @transform_7, window_bounds = array<i64: 16, 2>}]} {
    %c0 = arith.constant 0 : index
    %c0_0 = arith.constant 0 : index
    %0 = vector.load %arg1[%c0, %c0_0] : memref<16x4xbf16, #tpu.memory_space<vmem>>, vector<16x4xbf16>
    %c0_1 = arith.constant 0 : index
    %c0_2 = arith.constant 0 : index
    %1 = vector.load %arg2[%c0_1, %c0_2] : memref<4x128xbf16, #tpu.memory_space<vmem>>, vector<4x128xbf16>
    %cst = arith.constant dense<0.000000e+00> : vector<16x128xf32>
    %2 = tpu.matmul %0, %1, %cst {dimension_numbers = #tpu.dot_dimension_numbers<[1], [0], [0], [1], [0, 0, 1, 1], [], []>} : vector<16x4xbf16>, vector<4x128xbf16>, vector<16x128xf32> -> vector<16x128xf32>
    %c0_3 = arith.constant 0 : index
    %c0_4 = arith.constant 0 : index
    %3 = vector.load %arg3[%c0_3, %c0_4] : memref<1x128xf32, #tpu.memory_space<vmem>>, vector<1x128xf32>
    %4 = vector.broadcast %3 : vector<1x128xf32> to vector<16x128xf32>
    %5 = arith.addf %2, %4 : vector<16x128xf32>
    %cst_5 = arith.constant 0.000000e+00 : f32
    %6 = vector.broadcast %cst_5 : f32 to vector<16x128xf32>
    %7 = arith.maximumf %5, %6 : vector<16x128xf32>
    %8 = arith.truncf %7 : vector<16x128xf32> to vector<16x128xbf16>
    %c0_6 = arith.constant 0 : index
    %c0_7 = arith.constant 0 : index
    %9 = vector.load %arg4[%c0_6, %c0_7] : memref<128x128xbf16, #tpu.memory_space<vmem>>, vector<128x128xbf16>
    %cst_8 = arith.constant dense<0.000000e+00> : vector<16x128xf32>
    %10 = tpu.matmul %8, %9, %cst_8 {dimension_numbers = #tpu.dot_dimension_numbers<[1], [0], [0], [1], [0, 0, 1, 1], [], []>} : vector<16x128xbf16>, vector<128x128xbf16>, vector<16x128xf32> -> vector<16x128xf32>
    %c0_9 = arith.constant 0 : index
    %c0_10 = arith.constant 0 : index
    %11 = vector.load %arg5[%c0_9, %c0_10] : memref<1x128xf32, #tpu.memory_space<vmem>>, vector<1x128xf32>
    %12 = vector.broadcast %11 : vector<1x128xf32> to vector<16x128xf32>
    %13 = arith.addf %10, %12 : vector<16x128xf32>
    %cst_11 = arith.constant 0.000000e+00 : f32
    %14 = vector.broadcast %cst_11 : f32 to vector<16x128xf32>
    %15 = arith.maximumf %13, %14 : vector<16x128xf32>
    %16 = arith.truncf %15 : vector<16x128xf32> to vector<16x128xbf16>
    %c0_12 = arith.constant 0 : index
    %c0_13 = arith.constant 0 : index
    %17 = vector.load %arg6[%c0_12, %c0_13] : memref<128x2xbf16, #tpu.memory_space<vmem>>, vector<128x2xbf16>
    %cst_14 = arith.constant dense<0.000000e+00> : vector<16x2xf32>
    %18 = tpu.matmul %16, %17, %cst_14 {dimension_numbers = #tpu.dot_dimension_numbers<[1], [0], [0], [1], [0, 0, 1, 1], [], []>} : vector<16x128xbf16>, vector<128x2xbf16>, vector<16x2xf32> -> vector<16x2xf32>
    %c0_15 = arith.constant 0 : index
    %c0_16 = arith.constant 0 : index
    %19 = vector.load %arg7[%c0_15, %c0_16] : memref<1x2xf32, #tpu.memory_space<vmem>>, vector<1x2xf32>
    %20 = vector.broadcast %19 : vector<1x2xf32> to vector<16x2xf32>
    %21 = arith.addf %18, %20 : vector<16x2xf32>
    %c0_17 = arith.constant 0 : index
    %c0_18 = arith.constant 0 : index
    %22 = vector.load %arg8[%c0_17, %c0_18] : memref<16x2xf32, #tpu.memory_space<vmem>>, vector<16x2xf32>
    tpu.vector_store %arg8[%c0_17, %c0_18], %21 {strides = array<i32>} : memref<16x2xf32, #tpu.memory_space<vmem>>, vector<16x2xf32>,
    return
  }
  func.func @transform_0(%arg0: i32) -> (i32, i32) {
    %c0_i32 = arith.constant 0 : i32
    %c0_i32_0 = arith.constant 0 : i32
    return %arg0, %c0_i32 : i32, i32
  }
  func.func @transform_1(%arg0: i32) -> (i32, i32) {
    %c0_i32 = arith.constant 0 : i32
    %c0_i32_0 = arith.constant 0 : i32
    %c0_i32_1 = arith.constant 0 : i32
    return %c0_i32, %c0_i32_0 : i32, i32
  }
  func.func @transform_2(%arg0: i32) -> (i32, i32) {
    %c0_i32 = arith.constant 0 : i32
    %c0_i32_0 = arith.constant 0 : i32
    %c0_i32_1 = arith.constant 0 : i32
    return %c0_i32, %c0_i32_0 : i32, i32
  }
  func.func @transform_3(%arg0: i32) -> (i32, i32) {
    %c0_i32 = arith.constant 0 : i32
    %c0_i32_0 = arith.constant 0 : i32
    %c0_i32_1 = arith.constant 0 : i32
    return %c0_i32, %c0_i32_0 : i32, i32
  }
  func.func @transform_4(%arg0: i32) -> (i32, i32) {
    %c0_i32 = arith.constant 0 : i32
    %c0_i32_0 = arith.constant 0 : i32
    %c0_i32_1 = arith.constant 0 : i32
    return %c0_i32, %c0_i32_0 : i32, i32
  }
  func.func @transform_5(%arg0: i32) -> (i32, i32) {
    %c0_i32 = arith.constant 0 : i32
    %c0_i32_0 = arith.constant 0 : i32
    %c0_i32_1 = arith.constant 0 : i32
    return %c0_i32, %c0_i32_0 : i32, i32
  }
  func.func @transform_6(%arg0: i32) -> (i32, i32) {
    %c0_i32 = arith.constant 0 : i32
    %c0_i32_0 = arith.constant 0 : i32
    %c0_i32_1 = arith.constant 0 : i32
    return %c0_i32, %c0_i32_0 : i32, i32
  }
  func.func @transform_7(%arg0: i32) -> (i32, i32) {
    %c0_i32 = arith.constant 0 : i32
    %c0_i32_0 = arith.constant 0 : i32
    return %arg0, %c0_i32 : i32, i32
  }
}

</mosaic_0001>

<bundles_post_ra>
// kernel: qnetwork_forward.1
= control target key start
LH: loop header
LB: loop body
LE: loop exit
PB: predicated region body
PF: predicated region fallthrough
CT: control target
= control target key end

     0   :  { %vm43_vm0 = vcmask 1041408   ;;  %vm39_vm1 = vcmask 31744   ;;  %vm231_vm2 = vcmask 15360   ;;  %s436_s1 = inlined_call_operand.vmem [shape: bf16[4,128], index: 1, kind: input, shape index: {}]   ;;  %s437_s0 = inlined_call_operand.vmem [shape: bf16[16,4], index: 0, kind: input, shape index: {}]   ;;  %s438_s3 = inlined_call_operand.vmem [shape: bf16[128,128], index: 3, kind: input, shape index: {}]   ;;  %s439_s2 = inlined_call_operand.vmem [shape: f32[1,128], index: 2, kind: input, shape index: {}]   ;;  %s440_s4 = inlined_call_operand.vmem [shape: f32[1,128], index: 4, kind: input, shape index: {}]   ;;  %s441_s5 = inlined_call_operand.vmem [shape: bf16[128,2], index: 5, kind: input, shape index: {}]   ;;  %s442_s6 = inlined_call_operand.vmem [shape: f32[1,2], index: 6, kind: input, shape index: {}]   ;;  %s443_s7 = inlined_call_operand.vmem [shape: f32[16,2], index: 7, kind: output, shape index: {}]  }
   0x1   :  { %v29_v0 = vld [vmem:[%s436_s1] sm:$0x3]  ;;  %v315_v1 = vld [vmem:[%s438_s3 + $0x38] sm:$0xff]  ;;  %v314_v4 = vld [vmem:[%s438_s3 + $0x30] sm:$0xff] }
   0x2   :  { %v45_v2 = vsel %vm43_vm0, %v29_v0, 0  ;;  %v307_v3 = vld [vmem:[%s437_s0] sm:$0xff]  ;;  %132 = vmatpush.bf16.msra.mxu1 %v315_v1  ;;  %v313_v5 = vld [vmem:[%s438_s3 + $0x28] sm:$0xff]  ;;  %v311_v7 = vld [vmem:[%s438_s3 + $0x18] sm:$0xff] }
   0x3   :  { %54 = vmatpush.bf16.msra.mxu0 %v45_v2  ;;  %v312_v6 = vld [vmem:[%s438_s3 + $0x20] sm:$0xff]  ;;  %v310_v8 = vld [vmem:[%s438_s3 + $0x10] sm:$0xff]  ;;  %v309_v9 = vld [vmem:[%s438_s3 + $0x8] sm:$0xff] }
   0x4   :  { %v308_v10 = vld [vmem:[%s438_s3] sm:$0xff]  ;;  %v323_v11 = vld [vmem:[%s441_s5 + $0x38] sm:$0xff]  ;;  %v322_v12 = vld [vmem:[%s441_s5 + $0x30] sm:$0xff] }
   0x5   :  { %217 = vmatpush.bf16.msra.mxu2 %v323_v11  ;;  %v321_v13 = vld [vmem:[%s441_s5 + $0x28] sm:$0xff]  ;;  %v320_v14 = vld [vmem:[%s441_s5 + $0x20] sm:$0xff]  ;;  %v319_v23 = vld [vmem:[%s441_s5 + $0x18] sm:$0xff] }
   0x6   :  { %242 = vmatmul.msk.bf16.vlgmr.msra.gmra.mxu0 %vm39_vm1, %v307_v3  ;;  %133 = vmatpush.bf16.msra.mxu1 %v314_v4  ;;  %v324_v16 = vld [vmem:[%s439_s2] ss:$0 sm:$0xff]  ;;  %v318_v24 = vld [vmem:[%s441_s5 + $0x10] sm:$0xff]  ;;  %v317_v25 = vld [vmem:[%s441_s5 + $0x8] sm:$0xff] }
   0x7   :  { %v316_v26 = vld [vmem:[%s441_s5] sm:$0xff] }
   0x8   :  { %v325_v28 = vld [vmem:[%s440_s4] ss:$0 sm:$0xff] }
   0x9   :  { %218 = vmatpush.bf16.msra.mxu2 %v322_v12  ;;  %v326_v35 = vld [vmem:[%s442_s6] ss:$0 sm:$0xff] }
   0xa   :  { %134 = vmatpush.bf16.msra.mxu1 %v313_v5 }
   0xd   :  { %219 = vmatpush.bf16.msra.mxu2 %v321_v13 }
   0xe   :  { %135 = vmatpush.bf16.msra.mxu1 %v312_v6 }
  0x11   :  { %220 = vmatpush.bf16.msra.mxu2 %v320_v14 }
  0x12   :  { %136 = vmatpush.bf16.msra.mxu1 %v311_v7 }
  0x15   :  { %221 = vmatpush.bf16.msra.mxu2 %v319_v23 }
  0x16   :  { %137 = vmatpush.bf16.msra.mxu1 %v310_v8 }
  0x19   :  { %222 = vmatpush.bf16.msra.mxu2 %v318_v24 }
  0x1a   :  { %138 = vmatpush.bf16.msra.mxu1 %v309_v9 }
  0x1d   :  { %223 = vmatpush.bf16.msra.mxu2 %v317_v25 }
  0x1e   :  { %139 = vmatpush.bf16.msra.mxu1 %v308_v10 }
  0x21   :  { %224 = vmatpush.bf16.msra.mxu2 %v316_v26 }
  0x83   :  { %v56_v15 = vpop.f32.mrf.mxu0 }
  0x84   :  { %v57_v17 = vadd.f32 %v324_v16, %v56_v15 }
  0x86   :  { %v61_v20 = vmax.f32 %v57_v17, 0.0 }
  0x8b   :  { %v58_v18 = vpop.f32.mrf.mxu0 }
  0x8c   :  { %v59_v19 = vadd.f32 %v324_v16, %v58_v18 }
  0x8e   :  { %v62_v21 = vmax.f32 %v59_v19, 0.0 }
  0x90   :  { %v63_v22 = vpack.c.bf16 %v62_v21, %v61_v20 }
  0x92   :  { %140 = vmatmul.bf16.vlgmr.msra.gmra.mxu1 %v63_v22 }
 0x10f   :  { %v141_v27 = vpop.f32.mrf.mxu1 }
 0x110   :  { %v142_v29 = vadd.f32 %v325_v28, %v141_v27 }
 0x112   :  { %v146_v32 = vmax.f32 %v142_v29, 0.0 }
 0x117   :  { %v143_v30 = vpop.f32.mrf.mxu1 }
 0x118   :  { %v144_v31 = vadd.f32 %v325_v28, %v143_v30 }
 0x11a   :  { %v147_v33 = vmax.f32 %v144_v31, 0.0 }
 0x11c   :  { %v148_v34 = vpack.c.bf16 %v147_v33, %v146_v32 }
 0x11e   :  { %225 = vmatmul.bf16.vlgmr.msra.gmra.mxu2 %v148_v34 }
 0x1a1   :  { %v226_v36 = vpop.f32.mrf.mxu2 }
 0x1a2   :  { %v227_v37 = vadd.f32 %v326_v35, %v226_v36 }
 0x1a4   :  { %232 = vst.msk [vmem:[%s443_s7] sm:$0xff] %vm231_vm2, %v227_v37 }
 0x1a9   :  { %v228_v38 = vpop.f32.mrf.mxu2 }
 0x1aa   :  { %v229_v39 = vadd.f32 %v326_v35, %v228_v38 }
 0x1ac   :  { %233 = vst.msk [vmem:[%s443_s7 + $0x8] sm:$0xff] %vm231_vm2, %v229_v39 }

</bundles_post_ra>
